<compile_context>
chip_gen: v7x
topology: tpu7x:2x2x1
jax: 0.10.0
libtpu: 0.0.40
codegen_flags: <defaults>
</compile_context>

<pallas_src>
import functools

import jax
import jax.numpy as jnp
from jax.experimental import pallas as pl
from jax.experimental.pallas import tpu as pltpu

B, C, H, W = 2, 4, 16, 16      # input:  complex64 (B, C, H, W)
CIN, COUT, K = 2, 2, 3         # inner net: Conv2d(2, 2, kernel_size=3, padding=1)


# ---------------------------------------------------------------------------
# Pallas kernel: batched 3x3 conv (2 in-ch, 2 out-ch) on flat-spatial rows.
# ---------------------------------------------------------------------------
def _conv3x3_kernel(xr_ref, xi_ref, w_ref, b_ref, o_ref, pr_ref, pi_ref,
                    *, width, margin):
    # xr_ref, xi_ref: (1, NB, H*W)      VMEM  real / imag parts, one flat row per image
    # w_ref:          (COUT*CIN*K*K,)   SMEM  flattened OIHW weights
    # b_ref:          (COUT,)           SMEM  bias
    # o_ref:          (1, COUT, NB, H*W) VMEM lane-dense output slab
    # pr_ref, pi_ref: (NB, H*W + 2*margin) VMEM scratch (zero lane margins = padding)
    nb, f = xr_ref.shape[1], xr_ref.shape[2]
    wp = f + 2 * margin

    # In-kernel zero padding: clear the margins, write image rows into the interior
    # (margin is a multiple of 128 -> the interior store is lane-aligned).
    pr_ref[...] = jnp.zeros((nb, wp), jnp.float32)
    pi_ref[...] = jnp.zeros((nb, wp), jnp.float32)
    pr_ref[:, margin:margin + f] = xr_ref[0]
    pi_ref[:, margin:margin + f] = xi_ref[0]

    # x coordinate of every lane (flat index = y*W + x); W is a power of two.
    xpos = jax.lax.broadcasted_iota(jnp.int32, (nb, f), 1) & (width - 1)
    mask_l = xpos >= 1            # valid lanes for a left-shifted tap  (kx == 0)
    mask_r = xpos <= width - 2    # valid lanes for a right-shifted tap (kx == 2)

    acc0 = jnp.zeros((nb, f), jnp.float32) + b_ref[0]
    acc1 = jnp.zeros((nb, f), jnp.float32) + b_ref[1]

    for ci, pref in enumerate((pr_ref, pi_ref)):        # ci: 0 = real, 1 = imag
        for ky in range(K):
            for kx in range(K):
                # source flat offset (y + ky - 1)*W + (x + kx - 1); the y-borders
                # fall into the zero margins, the x-borders are masked below.
                off = margin + (ky - 1) * width + (kx - 1)
                slab = pref[:, off:off + f]             # shifted (NB, H*W) window
                if kx == 0:
                    slab = jnp.where(mask_l, slab, 0.0)
                elif kx == K - 1:
                    slab = jnp.where(mask_r, slab, 0.0)
                tap = ky * K + kx
                acc0 = acc0 + w_ref[(0 * CIN + ci) * K * K + tap] * slab
                acc1 = acc1 + w_ref[(1 * CIN + ci) * K * K + tap] * slab

    o_ref[0, 0] = acc0
    o_ref[0, 1] = acc1


def conv2x3x3_pallas(xr, xi, w, b):
    """Batched Conv2d(2->2, 3x3, padding=1) on flattened-spatial inputs.

    xr, xi: (G, NB, H*W) float32 — real / imag channel, one flat row per image.
    Returns (G, COUT, NB, H*W) float32.
    """
    g, nb, f = xr.shape
    assert f == H * W and (W & (W - 1)) == 0
    margin = max(128, W + 1)            # >= W+1 for the tap shifts; 128-aligned store
    wp = f + 2 * margin

    kernel = functools.partial(_conv3x3_kernel, width=W, margin=margin)
    return pl.pallas_call(
        kernel,
        out_shape=jax.ShapeDtypeStruct((g, COUT, nb, f), jnp.float32),
        grid_spec=pltpu.PrefetchScalarGridSpec(
            num_scalar_prefetch=0,
            grid=(g,),
            in_specs=[
                pl.BlockSpec((1, nb, f), lambda i: (i, 0, 0)),
                pl.BlockSpec((1, nb, f), lambda i: (i, 0, 0)),
                pl.BlockSpec(memory_space=pltpu.MemorySpace.SMEM),
                pl.BlockSpec(memory_space=pltpu.MemorySpace.SMEM),
            ],
            out_specs=pl.BlockSpec((1, COUT, nb, f), lambda i: (i, 0, 0, 0)),
            scratch_shapes=[
                pltpu.VMEM((nb, wp), jnp.float32),
                pltpu.VMEM((nb, wp), jnp.float32),
            ],
        ),
        compiler_params=pltpu.CompilerParams(dimension_semantics=("parallel",)),
    )(xr.astype(jnp.float32), xi.astype(jnp.float32),
      w.reshape(-1).astype(jnp.float32), b.astype(jnp.float32))


# ---------------------------------------------------------------------------
# ReshapeWrapper.forward with the reshape glue fused around the Pallas conv.
# ---------------------------------------------------------------------------
def reshape_wrapper_forward(x, w, b):
    bb, cc, hh, ww = x.shape
    n = bb * cc                         # channel_to_batch fold
    f = hh * ww
    g = 2 if n % 2 == 0 else 1          # 2 "parallel" blocks -> both TCs on v7x
    nb = n // g

    # complex -> 2 real channels (ch0 = real, ch1 = imag), fused: pure reshapes only.
    xr = x.real.reshape(g, nb, f)
    xi = x.imag.reshape(g, nb, f)

    ko = conv2x3x3_pallas(xr, xi, w, b)                       # (G, COUT, NB, H*W)
    y = ko.transpose(0, 2, 1, 3).reshape(n, COUT, hh, ww)     # conv out, folded batch

    # Literal ReshapeWrapper tail (row-major reshapes, identical to torch):
    y = y.reshape(bb, -1, hh, ww)                 # un-fold channel_to_batch
    y = y.reshape(bb, 2, -1, hh, ww)              # real_to_complex: OUTER factor = re/im
    return jax.lax.complex(y[:, 0], y[:, 1])


# ---------------------------------------------------------------------------
# Literal pure-JAX reference (XLA conv) for correctness checking.
# ---------------------------------------------------------------------------
def _conv2d_ref(xin, w, b):
    out = jax.lax.conv_general_dilated(
        xin.astype(jnp.float32), w.astype(jnp.float32),
        window_strides=(1, 1), padding=((1, 1), (1, 1)),
        dimension_numbers=("NCHW", "OIHW", "NCHW"))
    return out + b[None, :, None, None]


def reshape_wrapper_reference(x, w, b):
    """Literal transcription of the PyTorch ReshapeWrapper.forward."""
    xin = x.reshape((x.shape[0] * x.shape[1],) + x.shape[2:])[:, None]   # flatten + unsqueeze
    xr = jnp.stack([xin.real, xin.imag], axis=-1)                        # view_as_real
    xr = jnp.moveaxis(xr, -1, 1)                                         # moveaxis(-1, 1)
    xin = xr.reshape((xr.shape[0], xr.shape[1] * xr.shape[2]) + xr.shape[3:])  # flatten(1,2)
    y = _conv2d_ref(xin, w, b)
    y = y.reshape((x.shape[0], -1) + y.shape[2:])
    y = y.reshape((y.shape[0], 2, -1) + y.shape[2:])
    return jax.lax.complex(y[:, 0], y[:, 1])


if __name__ == "__main__":
    key = jax.random.PRNGKey(0)
    kre, kim, kw, kb = jax.random.split(key, 4)

    # Complex NCHW input, as the CMRxRecon nets consume.
    x = jax.lax.complex(
        jax.random.normal(kre, (B, C, H, W), jnp.float32),
        jax.random.normal(kim, (B, C, H, W), jnp.float32),
    )

    # Deterministic synthetic Conv2d(2, 2, 3, padding=1) parameters.
    w_conv = 0.1 * jax.random.normal(kw, (COUT, CIN, K, K), jnp.float32)
    b_conv = 0.1 * jax.random.normal(kb, (COUT,), jnp.float32)

    y = reshape_wrapper_forward(x, w_conv, b_conv)
    y = jax.block_until_ready(y)

    # Cross-check the fused Pallas path against the literal PyTorch-port reference
    # (also covers the wrapper-level channel split/order, per the review concern).
    y_ref = reshape_wrapper_reference(x, w_conv, b_conv)
    assert y.shape == (B, C, H, W) and jnp.iscomplexobj(y)
    assert jnp.allclose(y, y_ref, atol=1e-4, rtol=1e-4), "mismatch vs reference"

    print("KERNEL_OK")
</pallas_src>

<mosaic_0001>
module attributes {stable_mosaic.version = 11 : i64} {
  func.func @_conv3x3_kernel(%arg0: i32, %arg1: memref<1x4x256xf32, #tpu.memory_space<vmem>>, %arg2: memref<1x4x256xf32, #tpu.memory_space<vmem>>, %arg3: memref<36xf32, #tpu.memory_space<smem>>, %arg4: memref<2xf32, #tpu.memory_space<smem>>, %arg5: memref<1x2x4x256xf32, #tpu.memory_space<vmem>>, %arg6: memref<4x512xf32, #tpu.memory_space<vmem>>, %arg7: memref<4x512xf32, #tpu.memory_space<vmem>>) attributes {dimension_semantics = [#tpu.dimension_semantics<parallel>], iteration_bounds = array<i64: 2>, scalar_prefetch = 0 : i64, scratch_operands = 2 : i64, tpu.core_type = #tpu.core_type<tc>, window_params = [{transform_indices = @transform_0, window_bounds = array<i64: 1, 4, 256>}, {transform_indices = @transform_1, window_bounds = array<i64: 1, 4, 256>}, {transform_indices = @transform_2, window_bounds = array<i64: 36>}, {transform_indices = @transform_3, window_bounds = array<i64: 2>}, {transform_indices = @transform_4, window_bounds = array<i64: 1, 2, 4, 256>}]} {
    %cst = arith.constant 0.000000e+00 : f32
    %0 = vector.broadcast %cst : f32 to vector<4x512xf32>
    %c0 = arith.constant 0 : index
    %c0_0 = arith.constant 0 : index
    %1 = vector.load %arg6[%c0, %c0_0] : memref<4x512xf32, #tpu.memory_space<vmem>>, vector<4x512xf32>
    tpu.vector_store %arg6[%c0, %c0_0], %0 {strides = array<i32>} : memref<4x512xf32, #tpu.memory_space<vmem>>, vector<4x512xf32>,
    %cst_1 = arith.constant 0.000000e+00 : f32
    %2 = vector.broadcast %cst_1 : f32 to vector<4x512xf32>
    %c0_2 = arith.constant 0 : index
    %c0_3 = arith.constant 0 : index
    %3 = vector.load %arg7[%c0_2, %c0_3] : memref<4x512xf32, #tpu.memory_space<vmem>>, vector<4x512xf32>
    tpu.vector_store %arg7[%c0_2, %c0_3], %2 {strides = array<i32>} : memref<4x512xf32, #tpu.memory_space<vmem>>, vector<4x512xf32>,
    %c0_4 = arith.constant 0 : index
    %c0_5 = arith.constant 0 : index
    %c0_6 = arith.constant 0 : index
    %4 = vector.load %arg1[%c0_4, %c0_5, %c0_6] : memref<1x4x256xf32, #tpu.memory_space<vmem>>, vector<1x4x256xf32>
    %5 = vector.shape_cast %4 : vector<1x4x256xf32> to vector<4x256xf32>
    %c0_7 = arith.constant 0 : index
    %c128 = arith.constant 128 : index
    %6 = vector.load %arg6[%c0_7, %c128] : memref<4x512xf32, #tpu.memory_space<vmem>>, vector<4x256xf32>
    tpu.vector_store %arg6[%c0_7, %c128], %5 {strides = array<i32>} : memref<4x512xf32, #tpu.memory_space<vmem>>, vector<4x256xf32>,
    %c0_8 = arith.constant 0 : index
    %c0_9 = arith.constant 0 : index
    %c0_10 = arith.constant 0 : index
    %7 = vector.load %arg2[%c0_8, %c0_9, %c0_10] : memref<1x4x256xf32, #tpu.memory_space<vmem>>, vector<1x4x256xf32>
    %8 = vector.shape_cast %7 : vector<1x4x256xf32> to vector<4x256xf32>
    %c0_11 = arith.constant 0 : index
    %c128_12 = arith.constant 128 : index
    %9 = vector.load %arg7[%c0_11, %c128_12] : memref<4x512xf32, #tpu.memory_space<vmem>>, vector<4x256xf32>
    tpu.vector_store %arg7[%c0_11, %c128_12], %8 {strides = array<i32>} : memref<4x512xf32, #tpu.memory_space<vmem>>, vector<4x256xf32>,
    %10 = tpu.iota {dimensions = array<i32: 1>} : vector<4x256xi32>
    %c15_i32 = arith.constant 15 : i32
    %11 = vector.broadcast %c15_i32 : i32 to vector<4x256xi32>
    %12 = arith.andi %10, %11 : vector<4x256xi32>
    %c1_i32 = arith.constant 1 : i32
    %13 = vector.broadcast %c1_i32 : i32 to vector<4x256xi32>
    %14 = arith.cmpi sge, %12, %13 : vector<4x256xi32>
    %c14_i32 = arith.constant 14 : i32
    %15 = vector.broadcast %c14_i32 : i32 to vector<4x256xi32>
    %16 = arith.cmpi sle, %12, %15 : vector<4x256xi32>
    %cst_13 = arith.constant 0.000000e+00 : f32
    %17 = vector.broadcast %cst_13 : f32 to vector<4x256xf32>
    %c0_14 = arith.constant 0 : index
    %18 = memref.load %arg4[%c0_14] : memref<2xf32, #tpu.memory_space<smem>>
    %19 = vector.broadcast %18 : f32 to vector<4x256xf32>
    %20 = arith.addf %17, %19 : vector<4x256xf32>
    %cst_15 = arith.constant 0.000000e+00 : f32
    %21 = vector.broadcast %cst_15 : f32 to vector<4x256xf32>
    %c1 = arith.constant 1 : index
    %22 = memref.load %arg4[%c1] : memref<2xf32, #tpu.memory_space<smem>>
    %23 = vector.broadcast %22 : f32 to vector<4x256xf32>
    %24 = arith.addf %21, %23 : vector<4x256xf32>
    %c0_16 = arith.constant 0 : index
    %c111 = arith.constant 111 : index
    %25 = vector.load %arg6[%c0_16, %c111] : memref<4x512xf32, #tpu.memory_space<vmem>>, vector<4x256xf32>
    %cst_17 = arith.constant 0.000000e+00 : f32
    %26 = vector.broadcast %cst_17 : f32 to vector<4x256xf32>
    %27 = arith.select %14, %25, %26 : vector<4x256xi1>, vector<4x256xf32>
    %c0_18 = arith.constant 0 : index
    %28 = memref.load %arg3[%c0_18] : memref<36xf32, #tpu.memory_space<smem>>
    %29 = vector.broadcast %28 : f32 to vector<4x256xf32>
    %30 = arith.mulf %29, %27 : vector<4x256xf32>
    %31 = arith.addf %20, %30 : vector<4x256xf32>
    %c18 = arith.constant 18 : index
    %32 = memref.load %arg3[%c18] : memref<36xf32, #tpu.memory_space<smem>>
    %33 = vector.broadcast %32 : f32 to vector<4x256xf32>
    %34 = arith.mulf %33, %27 : vector<4x256xf32>
    %35 = arith.addf %24, %34 : vector<4x256xf32>
    %c0_19 = arith.constant 0 : index
    %c112 = arith.constant 112 : index
    %36 = vector.load %arg6[%c0_19, %c112] : memref<4x512xf32, #tpu.memory_space<vmem>>, vector<4x256xf32>
    %c1_20 = arith.constant 1 : index
    %37 = memref.load %arg3[%c1_20] : memref<36xf32, #tpu.memory_space<smem>>
    %38 = vector.broadcast %37 : f32 to vector<4x256xf32>
    %39 = arith.mulf %38, %36 : vector<4x256xf32>
    %40 = arith.addf %31, %39 : vector<4x256xf32>
    %c19 = arith.constant 19 : index
    %41 = memref.load %arg3[%c19] : memref<36xf32, #tpu.memory_space<smem>>
    %42 = vector.broadcast %41 : f32 to vector<4x256xf32>
    %43 = arith.mulf %42, %36 : vector<4x256xf32>
    %44 = arith.addf %35, %43 : vector<4x256xf32>
    %c0_21 = arith.constant 0 : index
    %c113 = arith.constant 113 : index
    %45 = vector.load %arg6[%c0_21, %c113] : memref<4x512xf32, #tpu.memory_space<vmem>>, vector<4x256xf32>
    %cst_22 = arith.constant 0.000000e+00 : f32
    %46 = vector.broadcast %cst_22 : f32 to vector<4x256xf32>
    %47 = arith.select %16, %45, %46 : vector<4x256xi1>, vector<4x256xf32>
    %c2 = arith.constant 2 : index
    %48 = memref.load %arg3[%c2] : memref<36xf32, #tpu.memory_space<smem>>
    %49 = vector.broadcast %48 : f32 to vector<4x256xf32>
    %50 = arith.mulf %49, %47 : vector<4x256xf32>
    %51 = arith.addf %40, %50 : vector<4x256xf32>
    %c20 = arith.constant 20 : index
    %52 = memref.load %arg3[%c20] : memref<36xf32, #tpu.memory_space<smem>>
    %53 = vector.broadcast %52 : f32 to vector<4x256xf32>
    %54 = arith.mulf %53, %47 : vector<4x256xf32>
    %55 = arith.addf %44, %54 : vector<4x256xf32>
    %c0_23 = arith.constant 0 : index
    %c127 = arith.constant 127 : index
    %56 = vector.load %arg6[%c0_23, %c127] : memref<4x512xf32, #tpu.memory_space<vmem>>, vector<4x256xf32>
    %cst_24 = arith.constant 0.000000e+00 : f32
    %57 = vector.broadcast %cst_24 : f32 to vector<4x256xf32>
    %58 = arith.select %14, %56, %57 : vector<4x256xi1>, vector<4x256xf32>
    %c3 = arith.constant 3 : index
    %59 = memref.load %arg3[%c3] : memref<36xf32, #tpu.memory_space<smem>>
    %60 = vector.broadcast %59 : f32 to vector<4x256xf32>
    %61 = arith.mulf %60, %58 : vector<4x256xf32>
    %62 = arith.addf %51, %61 : vector<4x256xf32>
    %c21 = arith.constant 21 : index
    %63 = memref.load %arg3[%c21] : memref<36xf32, #tpu.memory_space<smem>>
    %64 = vector.broadcast %63 : f32 to vector<4x256xf32>
    %65 = arith.mulf %64, %58 : vector<4x256xf32>
    %66 = arith.addf %55, %65 : vector<4x256xf32>
    %c0_25 = arith.constant 0 : index
    %c128_26 = arith.constant 128 : index
    %67 = vector.load %arg6[%c0_25, %c128_26] : memref<4x512xf32, #tpu.memory_space<vmem>>, vector<4x256xf32>
    %c4 = arith.constant 4 : index
    %68 = memref.load %arg3[%c4] : memref<36xf32, #tpu.memory_space<smem>>
    %69 = vector.broadcast %68 : f32 to vector<4x256xf32>
    %70 = arith.mulf %69, %67 : vector<4x256xf32>
    %71 = arith.addf %62, %70 : vector<4x256xf32>
    %c22 = arith.constant 22 : index
    %72 = memref.load %arg3[%c22] : memref<36xf32, #tpu.memory_space<smem>>
    %73 = vector.broadcast %72 : f32 to vector<4x256xf32>
    %74 = arith.mulf %73, %67 : vector<4x256xf32>
    %75 = arith.addf %66, %74 : vector<4x256xf32>
    %c0_27 = arith.constant 0 : index
    %c129 = arith.constant 129 : index
    %76 = vector.load %arg6[%c0_27, %c129] : memref<4x512xf32, #tpu.memory_space<vmem>>, vector<4x256xf32>
    %cst_28 = arith.constant 0.000000e+00 : f32
    %77 = vector.broadcast %cst_28 : f32 to vector<4x256xf32>
    %78 = arith.select %16, %76, %77 : vector<4x256xi1>, vector<4x256xf32>
    %c5 = arith.constant 5 : index
    %79 = memref.load %arg3[%c5] : memref<36xf32, #tpu.memory_space<smem>>
    %80 = vector.broadcast %79 : f32 to vector<4x256xf32>
    %81 = arith.mulf %80, %78 : vector<4x256xf32>
    %82 = arith.addf %71, %81 : vector<4x256xf32>
    %c23 = arith.constant 23 : index
    %83 = memref.load %arg3[%c23] : memref<36xf32, #tpu.memory_space<smem>>
    %84 = vector.broadcast %83 : f32 to vector<4x256xf32>
    %85 = arith.mulf %84, %78 : vector<4x256xf32>
    %86 = arith.addf %75, %85 : vector<4x256xf32>
    %c0_29 = arith.constant 0 : index
    %c143 = arith.constant 143 : index
    %87 = vector.load %arg6[%c0_29, %c143] : memref<4x512xf32, #tpu.memory_space<vmem>>, vector<4x256xf32>
    %cst_30 = arith.constant 0.000000e+00 : f32
    %88 = vector.broadcast %cst_30 : f32 to vector<4x256xf32>
    %89 = arith.select %14, %87, %88 : vector<4x256xi1>, vector<4x256xf32>
    %c6 = arith.constant 6 : index
    %90 = memref.load %arg3[%c6] : memref<36xf32, #tpu.memory_space<smem>>
    %91 = vector.broadcast %90 : f32 to vector<4x256xf32>
    %92 = arith.mulf %91, %89 : vector<4x256xf32>
    %93 = arith.addf %82, %92 : vector<4x256xf32>
    %c24 = arith.constant 24 : index
    %94 = memref.load %arg3[%c24] : memref<36xf32, #tpu.memory_space<smem>>
    %95 = vector.broadcast %94 : f32 to vector<4x256xf32>
    %96 = arith.mulf %95, %89 : vector<4x256xf32>
    %97 = arith.addf %86, %96 : vector<4x256xf32>
    %c0_31 = arith.constant 0 : index
    %c144 = arith.constant 144 : index
    %98 = vector.load %arg6[%c0_31, %c144] : memref<4x512xf32, #tpu.memory_space<vmem>>, vector<4x256xf32>
    %c7 = arith.constant 7 : index
    %99 = memref.load %arg3[%c7] : memref<36xf32, #tpu.memory_space<smem>>
    %100 = vector.broadcast %99 : f32 to vector<4x256xf32>
    %101 = arith.mulf %100, %98 : vector<4x256xf32>
    %102 = arith.addf %93, %101 : vector<4x256xf32>
    %c25 = arith.constant 25 : index
    %103 = memref.load %arg3[%c25] : memref<36xf32, #tpu.memory_space<smem>>
    %104 = vector.broadcast %103 : f32 to vector<4x256xf32>
    %105 = arith.mulf %104, %98 : vector<4x256xf32>
    %106 = arith.addf %97, %105 : vector<4x256xf32>
    %c0_32 = arith.constant 0 : index
    %c145 = arith.constant 145 : index
    %107 = vector.load %arg6[%c0_32, %c145] : memref<4x512xf32, #tpu.memory_space<vmem>>, vector<4x256xf32>
    %cst_33 = arith.constant 0.000000e+00 : f32
    %108 = vector.broadcast %cst_33 : f32 to vector<4x256xf32>
    %109 = arith.select %16, %107, %108 : vector<4x256xi1>, vector<4x256xf32>
    %c8 = arith.constant 8 : index
    %110 = memref.load %arg3[%c8] : memref<36xf32, #tpu.memory_space<smem>>
    %111 = vector.broadcast %110 : f32 to vector<4x256xf32>
    %112 = arith.mulf %111, %109 : vector<4x256xf32>
    %113 = arith.addf %102, %112 : vector<4x256xf32>
    %c26 = arith.constant 26 : index
    %114 = memref.load %arg3[%c26] : memref<36xf32, #tpu.memory_space<smem>>
    %115 = vector.broadcast %114 : f32 to vector<4x256xf32>
    %116 = arith.mulf %115, %109 : vector<4x256xf32>
    %117 = arith.addf %106, %116 : vector<4x256xf32>
    %c0_34 = arith.constant 0 : index
    %c111_35 = arith.constant 111 : index
    %118 = vector.load %arg7[%c0_34, %c111_35] : memref<4x512xf32, #tpu.memory_space<vmem>>, vector<4x256xf32>
    %cst_36 = arith.constant 0.000000e+00 : f32
    %119 = vector.broadcast %cst_36 : f32 to vector<4x256xf32>
    %120 = arith.select %14, %118, %119 : vector<4x256xi1>, vector<4x256xf32>
    %c9 = arith.constant 9 : index
    %121 = memref.load %arg3[%c9] : memref<36xf32, #tpu.memory_space<smem>>
    %122 = vector.broadcast %121 : f32 to vector<4x256xf32>
    %123 = arith.mulf %122, %120 : vector<4x256xf32>
    %124 = arith.addf %113, %123 : vector<4x256xf32>
    %c27 = arith.constant 27 : index
    %125 = memref.load %arg3[%c27] : memref<36xf32, #tpu.memory_space<smem>>
    %126 = vector.broadcast %125 : f32 to vector<4x256xf32>
    %127 = arith.mulf %126, %120 : vector<4x256xf32>
    %128 = arith.addf %117, %127 : vector<4x256xf32>
    %c0_37 = arith.constant 0 : index
    %c112_38 = arith.constant 112 : index
    %129 = vector.load %arg7[%c0_37, %c112_38] : memref<4x512xf32, #tpu.memory_space<vmem>>, vector<4x256xf32>
    %c10 = arith.constant 10 : index
    %130 = memref.load %arg3[%c10] : memref<36xf32, #tpu.memory_space<smem>>
    %131 = vector.broadcast %130 : f32 to vector<4x256xf32>
    %132 = arith.mulf %131, %129 : vector<4x256xf32>
    %133 = arith.addf %124, %132 : vector<4x256xf32>
    %c28 = arith.constant 28 : index
    %134 = memref.load %arg3[%c28] : memref<36xf32, #tpu.memory_space<smem>>
    %135 = vector.broadcast %134 : f32 to vector<4x256xf32>
    %136 = arith.mulf %135, %129 : vector<4x256xf32>
    %137 = arith.addf %128, %136 : vector<4x256xf32>
    %c0_39 = arith.constant 0 : index
    %c113_40 = arith.constant 113 : index
    %138 = vector.load %arg7[%c0_39, %c113_40] : memref<4x512xf32, #tpu.memory_space<vmem>>, vector<4x256xf32>
    %cst_41 = arith.constant 0.000000e+00 : f32
    %139 = vector.broadcast %cst_41 : f32 to vector<4x256xf32>
    %140 = arith.select %16, %138, %139 : vector<4x256xi1>, vector<4x256xf32>
    %c11 = arith.constant 11 : index
    %141 = memref.load %arg3[%c11] : memref<36xf32, #tpu.memory_space<smem>>
    %142 = vector.broadcast %141 : f32 to vector<4x256xf32>
    %143 = arith.mulf %142, %140 : vector<4x256xf32>
    %144 = arith.addf %133, %143 : vector<4x256xf32>
    %c29 = arith.constant 29 : index
    %145 = memref.load %arg3[%c29] : memref<36xf32, #tpu.memory_space<smem>>
    %146 = vector.broadcast %145 : f32 to vector<4x256xf32>
    %147 = arith.mulf %146, %140 : vector<4x256xf32>
    %148 = arith.addf %137, %147 : vector<4x256xf32>
    %c0_42 = arith.constant 0 : index
    %c127_43 = arith.constant 127 : index
    %149 = vector.load %arg7[%c0_42, %c127_43] : memref<4x512xf32, #tpu.memory_space<vmem>>, vector<4x256xf32>
    %cst_44 = arith.constant 0.000000e+00 : f32
    %150 = vector.broadcast %cst_44 : f32 to vector<4x256xf32>
    %151 = arith.select %14, %149, %150 : vector<4x256xi1>, vector<4x256xf32>
    %c12 = arith.constant 12 : index
    %152 = memref.load %arg3[%c12] : memref<36xf32, #tpu.memory_space<smem>>
    %153 = vector.broadcast %152 : f32 to vector<4x256xf32>
    %154 = arith.mulf %153, %151 : vector<4x256xf32>
    %155 = arith.addf %144, %154 : vector<4x256xf32>
    %c30 = arith.constant 30 : index
    %156 = memref.load %arg3[%c30] : memref<36xf32, #tpu.memory_space<smem>>
    %157 = vector.broadcast %156 : f32 to vector<4x256xf32>
    %158 = arith.mulf %157, %151 : vector<4x256xf32>
    %159 = arith.addf %148, %158 : vector<4x256xf32>
    %c0_45 = arith.constant 0 : index
    %c128_46 = arith.constant 128 : index
    %160 = vector.load %arg7[%c0_45, %c128_46] : memref<4x512xf32, #tpu.memory_space<vmem>>, vector<4x256xf32>
    %c13 = arith.constant 13 : index
    %161 = memref.load %arg3[%c13] : memref<36xf32, #tpu.memory_space<smem>>
    %162 = vector.broadcast %161 : f32 to vector<4x256xf32>
    %163 = arith.mulf %162, %160 : vector<4x256xf32>
    %164 = arith.addf %155, %163 : vector<4x256xf32>
    %c31 = arith.constant 31 : index
    %165 = memref.load %arg3[%c31] : memref<36xf32, #tpu.memory_space<smem>>
    %166 = vector.broadcast %165 : f32 to vector<4x256xf32>
    %167 = arith.mulf %166, %160 : vector<4x256xf32>
    %168 = arith.addf %159, %167 : vector<4x256xf32>
    %c0_47 = arith.constant 0 : index
    %c129_48 = arith.constant 129 : index
    %169 = vector.load %arg7[%c0_47, %c129_48] : memref<4x512xf32, #tpu.memory_space<vmem>>, vector<4x256xf32>
    %cst_49 = arith.constant 0.000000e+00 : f32
    %170 = vector.broadcast %cst_49 : f32 to vector<4x256xf32>
    %171 = arith.select %16, %169, %170 : vector<4x256xi1>, vector<4x256xf32>
    %c14 = arith.constant 14 : index
    %172 = memref.load %arg3[%c14] : memref<36xf32, #tpu.memory_space<smem>>
    %173 = vector.broadcast %172 : f32 to vector<4x256xf32>
    %174 = arith.mulf %173, %171 : vector<4x256xf32>
    %175 = arith.addf %164, %174 : vector<4x256xf32>
    %c32 = arith.constant 32 : index
    %176 = memref.load %arg3[%c32] : memref<36xf32, #tpu.memory_space<smem>>
    %177 = vector.broadcast %176 : f32 to vector<4x256xf32>
    %178 = arith.mulf %177, %171 : vector<4x256xf32>
    %179 = arith.addf %168, %178 : vector<4x256xf32>
    %c0_50 = arith.constant 0 : index
    %c143_51 = arith.constant 143 : index
    %180 = vector.load %arg7[%c0_50, %c143_51] : memref<4x512xf32, #tpu.memory_space<vmem>>, vector<4x256xf32>
    %cst_52 = arith.constant 0.000000e+00 : f32
    %181 = vector.broadcast %cst_52 : f32 to vector<4x256xf32>
    %182 = arith.select %14, %180, %181 : vector<4x256xi1>, vector<4x256xf32>
    %c15 = arith.constant 15 : index
    %183 = memref.load %arg3[%c15] : memref<36xf32, #tpu.memory_space<smem>>
    %184 = vector.broadcast %183 : f32 to vector<4x256xf32>
    %185 = arith.mulf %184, %182 : vector<4x256xf32>
    %186 = arith.addf %175, %185 : vector<4x256xf32>
    %c33 = arith.constant 33 : index
    %187 = memref.load %arg3[%c33] : memref<36xf32, #tpu.memory_space<smem>>
    %188 = vector.broadcast %187 : f32 to vector<4x256xf32>
    %189 = arith.mulf %188, %182 : vector<4x256xf32>
    %190 = arith.addf %179, %189 : vector<4x256xf32>
    %c0_53 = arith.constant 0 : index
    %c144_54 = arith.constant 144 : index
    %191 = vector.load %arg7[%c0_53, %c144_54] : memref<4x512xf32, #tpu.memory_space<vmem>>, vector<4x256xf32>
    %c16 = arith.constant 16 : index
    %192 = memref.load %arg3[%c16] : memref<36xf32, #tpu.memory_space<smem>>
    %193 = vector.broadcast %192 : f32 to vector<4x256xf32>
    %194 = arith.mulf %193, %191 : vector<4x256xf32>
    %195 = arith.addf %186, %194 : vector<4x256xf32>
    %c34 = arith.constant 34 : index
    %196 = memref.load %arg3[%c34] : memref<36xf32, #tpu.memory_space<smem>>
    %197 = vector.broadcast %196 : f32 to vector<4x256xf32>
    %198 = arith.mulf %197, %191 : vector<4x256xf32>
    %199 = arith.addf %190, %198 : vector<4x256xf32>
    %c0_55 = arith.constant 0 : index
    %c145_56 = arith.constant 145 : index
    %200 = vector.load %arg7[%c0_55, %c145_56] : memref<4x512xf32, #tpu.memory_space<vmem>>, vector<4x256xf32>
    %cst_57 = arith.constant 0.000000e+00 : f32
    %201 = vector.broadcast %cst_57 : f32 to vector<4x256xf32>
    %202 = arith.select %16, %200, %201 : vector<4x256xi1>, vector<4x256xf32>
    %c17 = arith.constant 17 : index
    %203 = memref.load %arg3[%c17] : memref<36xf32, #tpu.memory_space<smem>>
    %204 = vector.broadcast %203 : f32 to vector<4x256xf32>
    %205 = arith.mulf %204, %202 : vector<4x256xf32>
    %206 = arith.addf %195, %205 : vector<4x256xf32>
    %c35 = arith.constant 35 : index
    %207 = memref.load %arg3[%c35] : memref<36xf32, #tpu.memory_space<smem>>
    %208 = vector.broadcast %207 : f32 to vector<4x256xf32>
    %209 = arith.mulf %208, %202 : vector<4x256xf32>
    %210 = arith.addf %199, %209 : vector<4x256xf32>
    %c0_58 = arith.constant 0 : index
    %c0_59 = arith.constant 0 : index
    %c0_60 = arith.constant 0 : index
    %c0_61 = arith.constant 0 : index
    %211 = vector.load %arg5[%c0_58, %c0_59, %c0_60, %c0_61] : memref<1x2x4x256xf32, #tpu.memory_space<vmem>>, vector<1x1x4x256xf32>
    %212 = vector.shape_cast %211 : vector<1x1x4x256xf32> to vector<4x256xf32>
    %213 = vector.shape_cast %206 : vector<4x256xf32> to vector<1x1x4x256xf32>
    tpu.vector_store %arg5[%c0_58, %c0_59, %c0_60, %c0_61], %213 {strides = array<i32>} : memref<1x2x4x256xf32, #tpu.memory_space<vmem>>, vector<1x1x4x256xf32>,
    %c0_62 = arith.constant 0 : index
    %c1_63 = arith.constant 1 : index
    %c0_64 = arith.constant 0 : index
    %c0_65 = arith.constant 0 : index
    %214 = vector.load %arg5[%c0_62, %c1_63, %c0_64, %c0_65] : memref<1x2x4x256xf32, #tpu.memory_space<vmem>>, vector<1x1x4x256xf32>
    %215 = vector.shape_cast %214 : vector<1x1x4x256xf32> to vector<4x256xf32>
    %216 = vector.shape_cast %210 : vector<4x256xf32> to vector<1x1x4x256xf32>
    tpu.vector_store %arg5[%c0_62, %c1_63, %c0_64, %c0_65], %216 {strides = array<i32>} : memref<1x2x4x256xf32, #tpu.memory_space<vmem>>, vector<1x1x4x256xf32>,
    return
  }
  func.func @transform_0(%arg0: i32) -> (i32, i32, i32) {
    %c0_i32 = arith.constant 0 : i32
    %c0_i32_0 = arith.constant 0 : i32
    %c0_i32_1 = arith.constant 0 : i32
    return %arg0, %c0_i32, %c0_i32_0 : i32, i32, i32
  }
  func.func @transform_1(%arg0: i32) -> (i32, i32, i32) {
    %c0_i32 = arith.constant 0 : i32
    %c0_i32_0 = arith.constant 0 : i32
    %c0_i32_1 = arith.constant 0 : i32
    return %arg0, %c0_i32, %c0_i32_0 : i32, i32, i32
  }
  func.func @transform_2(%arg0: i32) -> i32 {
    %c0_i32 = arith.constant 0 : i32
    %c0_i32_0 = arith.constant 0 : i32
    return %c0_i32 : i32
  }
  func.func @transform_3(%arg0: i32) -> i32 {
    %c0_i32 = arith.constant 0 : i32
    %c0_i32_0 = arith.constant 0 : i32
    return %c0_i32 : i32
  }
  func.func @transform_4(%arg0: i32) -> (i32, i32, i32, i32) {
    %c0_i32 = arith.constant 0 : i32
    %c0_i32_0 = arith.constant 0 : i32
    %c0_i32_1 = arith.constant 0 : i32
    %c0_i32_2 = arith.constant 0 : i32
    return %arg0, %c0_i32, %c0_i32_0, %c0_i32_1 : i32, i32, i32, i32
  }
}

</mosaic_0001>

<bundles_post_ra>
// kernel: tpu_custom_call.1
= control target key start
LH: loop header
LB: loop body
LE: loop exit
PB: predicated region body
PF: predicated region fallthrough
CT: control target
= control target key end

     0   :  { %s1964_s0 = inlined_call_operand.hbm [shape: f32[2,4,256], index: 0, kind: input, shape index: {}]   ;;  %s1965_s1 = inlined_call_operand.hbm [shape: f32[2,4,256], index: 1, kind: input, shape index: {}]   ;;  %s1966_s2 = inlined_call_operand.vmem [shape: f32[36], index: 2, kind: input, shape index: {}]   ;;  %s1967_s3 = inlined_call_operand.vmem [shape: f32[2], index: 3, kind: input, shape index: {}]   ;;  %s1968_s4 = inlined_call_operand.hbm [shape: f32[2,2,4,256], index: 4, kind: output, shape index: {}]  }
   0x1   :  { %1974 = sst [smem:[#allocation19_spill]] %s1964_s0 }
   0x2   :  { %9 = vsyncpa [#allocation5], 0 }
   0x3   :  { %11 = vsyncpa [#allocation5 + $0x1], 0 }
   0x4   :  { %12 = vsyncpa [#allocation9], 0 }
   0x5   :  { %14 = vsyncpa [#allocation9 + $0x1], 0 }
   0x6   :  { %15 = vsyncpa [#allocation7], 0 }
   0x7   :  { %16 = vsyncpa [#allocation12], 0 }
   0x8   :  { %17 = vsyncpa [#allocation6], 0 }
   0x9   :  { %19 = vsyncpa [#allocation6 + $0x1], 0  ;;  %s1360_s15 = smov 0   ;;  %s1362_s16 = smov 0  }
   0xa   :  { %s1364_s17 = smov 0   ;;  %s1366_s18 = smov 0  }
   0xb LB: > { %s1381_s19 = sadd.s32 4294967295, %s1317_s18   ;;  %s995_s20 = sadd.s32 4294967294, %s1317_s18   ;;  %s1317_s18 = sphi %s1366_s18, %s2004_s18   ;;  %s1313_s17 = sphi %s1364_s17, %s2003_s17   ;;  %s1309_s16 = sphi %s1362_s16, %s2002_s16   ;;  %s1305_s15 = sphi %s1360_s15, %s2001_s15  }
   0xc   : > { %p45_p0 = scmp.ne.s32.totalorder %s1309_s16, %s1305_s15  ;;  %p1969_p1 = scmp.eq.s32.totalorder %s1381_s19, 0 }
   0xd   : > { %p143_p3 = scmp.eq.s32.totalorder %s995_s20, 1  ;;  %p996_p5 = scmp.ge.s32.totalorder %s1317_s18, 1 }
   0xe   : > { %p1390_p4 = por %p1969_p1, %p45_p0  ;;  %p150_p7 = scmp.lt.s32.totalorder %s1317_s18, 3 }
   0xf   : > { %p1395_p6 = por %p143_p3, %p45_p0  ;;  %s163_s25 = sshll.u32 %s1966_s2, 4  ;;  %s164_s25 = int_to_ptr.vmem [resolvable:$true] %s163_s25 }
  0x10   : > { %s1975_s21 = scalar_select %p1390_p4, 1, 0 }
  0x11   : > { %s1976_s22 = scalar_select %p1395_p6, 1, 0 }
  0x12   : > { %p1403_p8 = pnand %p996_p5, %p150_p7  ;;  %s174_s29 = sshll.u32 %s1967_s3, 4  ;;  %s175_s29 = int_to_ptr.vmem [resolvable:$true] %s174_s29 }
  0x13   : > { %s1420_s5 = sadd.s32 1, %s1317_s18   ;;  %s1149_s7 = scalar_lea.vmem %s164_s25, 16 }
  0x14   : > { %s1977_s26 = scalar_select %p1403_p8, 1, 0 }
  0x15   : > { %p1071_p10 = pneg %p1403_p8  ;;  %s29_s6 = ssub.s32 %s1317_s18, %s1420_s5 }
  0x16   : > { %p1150_p12 = scmp.ne.s32.totalorder %s164_s25, %s1149_s7  ;;  %p1157_p5 = scmp.lt.s32.totalorder %s164_s25, %s164_s25 }
  0x17   : > { %p1415_p11 = pnand %p1071_p10, %p1969_p1  ;;  %p1158_p7 = scmp.lt.s32.totalorder %s1149_s7, %s1149_s7 }
  0x19   : > { %p1151_p13 = pneg %p1415_p11  ;;  %p1159_p9 = por %p1158_p7, %p1157_p5 }
  0x1b   : > { %p1152_p0 = pnand %p1151_p13, %p1150_p12 }
  0x1d   : > { %p1153_p3 = pneg %p1152_p0 }
  0x1f   : > { %p1160_p2 = pnand %p1159_p9, %p1153_p3 }
  0x21   : > { %1163 = shalt.err (!%p1160_p2)
}
  0x22   : > { %s1319_s8 = smov [#allocation10]   ;;  %s1164_s9 = scalar_lea.vmem %s175_s29, 16 }
  0x23   : > { %1074 = dma.vmem_to_smem (!%p1415_p11), %s164_s25, 16, %s1319_s8, [#allocation7]  }
  0x24   : > { %p1165_p10 = scmp.ne.s32.totalorder %s175_s29, %s1164_s9  ;;  %p1172_p4 = scmp.lt.s32.totalorder %s175_s29, %s175_s29 }
  0x25   : > { %p1173_p8 = scmp.lt.s32.totalorder %s1164_s9, %s1164_s9 }
  0x26   : > { %p1167_p1 = pnand %p1165_p10, %p1151_p13 }
  0x27   : > { %p1174_p12 = por %p1173_p8, %p1172_p4 }
  0x28   : > { %p1168_p6 = pneg %p1167_p1 }
  0x2a   : > { %p1175_p0 = pnand %p1174_p12, %p1168_p6 }
  0x2c   : > { %1178 = shalt.err (!%p1175_p0)
}
  0x2d   : > { %s1320_s10 = smov [#allocation11]   ;;  %p30_p2 = scmp.eq.s32.totalorder %s29_s6, 0 }
  0x2e   : > { %1077 = dma.vmem_to_smem (!%p1415_p11), %s175_s29, 16, %s1320_s10, [#allocation12]  }
  0x2f   : > { %s32_s11 = sadd.s32 1, %s1313_s17  ;;  %p39_p1 = scmp.ne.s32.totalorder %s1313_s17, %s1309_s16 }
  0x30   : > { %p40_p9 = scmp.eq.s32.totalorder %s1317_s18, 0  ;;  %p1979_p6 = scmp.eq.s32.totalorder %s1381_s19, 1 }
  0x31   : > { %s1435_s12 = scalar_select %p30_p2, %s1313_s17, %s32_s11  }
  0x32   : > { %p41_p4 = por %p40_p9, %p39_p1  ;;  %p1439_p8 = por %p1979_p6, %p39_p1 }
  0x33   : > { %p1091_p13 = scmp.lt.s32.totalorder %s1317_s18, 2  ;;  %s1445_s14 = sand.u32 1, %s1313_s17  }
  0x34   : > { %s1980_s13 = scalar_select %p1439_p8, 1, 0 }
  0x35   : > { %s1972_s20 = sshll.u32 %s1445_s14, 3  ;;  %s1054_s23 = sshll.u32 %s1317_s18, 7 }
  0x36   : > { %s1981_s0 = sld [smem:[#allocation19_spill]]  ;;  %s189_s28 = scalar_lea.vmem [#allocation4], %s1972_s20 }
  0x37   : > { %s197_s29 = sshll.u32 %s189_s28, 4  ;;  %p1458_p11 = pnand %p1091_p13, %p41_p4  ;;  %s1456_s29 = int_to_ptr.vmem [resolvable:$true] %s197_s29 }
  0x38   : > { %s1465_s8 = scalar_lea.hbm %s1965_s1, %s1054_s23  ;;  %s186_s9 = scalar_lea.sflag [#allocation5], %s1445_s14 }
  0x39   : > { %p1181_p5 = pneg %p1458_p11 }
  0x3c   : > { %s1452_s27 = scalar_lea.hbm %s1981_s0, %s1054_s23  ;;  %s1184_s25 = scalar_lea.hbm %s1981_s0, 256 }
  0x3d   : > { %s1179_s10 = scalar_lea.hbm %s1452_s27, 128  ;;  %p1185_p12 = scmp.lt.u32.totalorder %s1452_s27, %s1981_s0 }
  0x3e   : > { %p1180_p3 = scmp.ne.s32.totalorder %s1452_s27, %s1179_s10  ;;  %p1186_p0 = scmp.lt.u32.totalorder %s1184_s25, %s1179_s10 }
  0x3f   : > { %p1188_p1 = scmp.lt.u32.totalorder %s1179_s10, %s1452_s27 }
  0x40   : > { %p1182_p7 = pnand %p1181_p5, %p1180_p3  ;;  %p1187_p2 = por %p1186_p0, %p1185_p12 }
  0x42   : > { %p1183_p10 = pneg %p1182_p7  ;;  %p1189_p9 = por %p1188_p1, %p1187_p2 }
  0x44   : > { %p1190_p4 = pnand %p1189_p9, %p1183_p10 }
  0x46   : > { %1193 = shalt.err (!%p1190_p4)
}
  0x47   : > { %s1194_s23 = scalar_lea.vmem %s1456_s29, 128  ;;  %s1321_s6 = smov [#allocation4]  }
  0x48   : > { %p1195_p6 = scmp.ne.s32.totalorder %s1456_s29, %s1194_s23  ;;  %s1199_s7 = sshll.u32 %s1321_s6, 4  ;;  %s1200_s7 = int_to_ptr.vmem [resolvable:$false] %s1199_s7 }
  0x49   : > { %s1201_s20 = scalar_lea.vmem %s1200_s7, 256  ;;  %p1202_p7 = scmp.lt.s32.totalorder %s1456_s29, %s1200_s7 }
  0x4a   : > { %p1197_p13 = pnand %p1195_p6, %p1181_p5  ;;  %p1203_p12 = scmp.lt.s32.totalorder %s1201_s20, %s1194_s23 }
  0x4c   : > { %p1198_p3 = pneg %p1197_p13  ;;  %p1204_p0 = por %p1203_p12, %p1202_p7 }
  0x4e   : > { %p1205_p2 = pnand %p1204_p0, %p1198_p3 }
  0x50   : > { %1208 = shalt.err (!%p1205_p2)
}
  0x51   : > { %1081 = dma.hbm_to_vmem [thread:$0]  (!%p1458_p11), %s1452_s27, 128, %s1456_s29, %s186_s9  }
  0x52   : > { %s1983_s10 = sshll.u32 %s1445_s14, 3  ;;  %s205_s25 = scalar_lea.sflag [#allocation9], %s1445_s14 }
  0x53   : > { %s208_s11 = scalar_lea.vmem [#allocation8], %s1983_s10  ;;  %s1209_s28 = scalar_lea.hbm %s1465_s8, 128 }
  0x54   : > { %s216_s24 = sshll.u32 %s208_s11, 4  ;;  %p1210_p10 = scmp.ne.s32.totalorder %s1465_s8, %s1209_s28  ;;  %s217_s24 = int_to_ptr.vmem [resolvable:$true] %s216_s24 }
  0x55   : > { %s1214_s7 = scalar_lea.hbm %s1965_s1, 256  ;;  %p1215_p4 = scmp.lt.u32.totalorder %s1465_s8, %s1965_s1 }
  0x56   : > { %p1212_p1 = pnand %p1210_p10, %p1181_p5  ;;  %p1216_p6 = scmp.lt.u32.totalorder %s1214_s7, %s1209_s28 }
  0x57   : > { %p1218_p3 = scmp.lt.u32.totalorder %s1209_s28, %s1465_s8 }
  0x58   : > { %p1213_p9 = pneg %p1212_p1  ;;  %p1217_p13 = por %p1216_p6, %p1215_p4 }
  0x5a   : > { %p1219_p7 = por %p1218_p3, %p1217_p13 }
  0x5c   : > { %p1220_p12 = pnand %p1219_p7, %p1213_p9 }
  0x5e   : > { %1223 = shalt.err (!%p1220_p12)
}
  0x5f   : > { %s1224_s14 = scalar_lea.vmem %s217_s24, 128  ;;  %s1322_s27 = smov [#allocation8]  }
  0x60   : > { %p1225_p0 = scmp.ne.s32.totalorder %s217_s24, %s1224_s14  ;;  %s1229_s29 = sshll.u32 %s1322_s27, 4  ;;  %s1230_s29 = int_to_ptr.vmem [resolvable:$false] %s1229_s29 }
  0x61   : > { %s1231_s9 = scalar_lea.vmem %s1230_s29, 256  ;;  %p1232_p1 = scmp.lt.s32.totalorder %s217_s24, %s1230_s29 }
  0x62   : > { %p1227_p2 = pnand %p1225_p0, %p1181_p5  ;;  %p1233_p8 = scmp.lt.s32.totalorder %s1231_s9, %s1224_s14 }
  0x64   : > { %p1228_p10 = pneg %p1227_p2  ;;  %p1234_p4 = por %p1233_p8, %p1232_p1 }
  0x66   : > { %p1235_p6 = pnand %p1234_p4, %p1228_p10 }
  0x68   : > { %1238 = shalt.err (!%p1235_p6)
}
  0x69   : > { %1084 = dma.hbm_to_vmem [thread:$0]  (!%p1458_p11), %s1465_s8, 128, %s217_s24, %s205_s25  }
  0x6a   : > { %p1984_p9 = scmp.ne.s32.totalorder %s1977_s26, 0 }
  0x6b   : > { %s1518_s0 = sand.u32 (!%p1984_p9), 1, %s1309_s16   ;;  %p1985_p5 = scmp.ne.s32.totalorder (!%p1984_p9), %s1975_s21, 0 }
  0x6c   : > { %225 = sbr.rel (%p1984_p9) target bundleno = 391 (0x187), region = 36  ;;  %s1007_s10 = sshll.u32 (!%p1984_p9), %s1518_s0, 3 }
  0x6d   : > { %s228_s11 = scalar_lea.sflag (!%p1984_p9), [#allocation5], %s1518_s0  ;;  %s231_s28 = scalar_lea.vmem (!%p1984_p9), [#allocation4], %s1007_s10 }
  0x73   : > { %1284 = dma.done.wait (%p1985_p5), %s228_s11, 128  }
  0x74   : > { %1286 = vsyncadd (%p1985_p5), %s228_s11, 4294967168  ;;  %s237_s30 = scalar_lea.sflag [#allocation9], %s1518_s0  ;;  %s240_s8 = scalar_lea.vmem [#allocation8], %s1007_s10 }
  0x75   : > { %1288 = dma.done.wait (%p1985_p5), %s237_s30, 128  }
  0x76   : > { %1290 = vsyncadd (%p1985_p5), %s237_s30, 4294967168  ;;  %p1986_p8 = scmp.eq.s32.totalorder %s1381_s19, 0 }
  0x78   : > { %1292 = dma.done.wait (%p1986_p8), [#allocation7], 16   ;;  %p1987_p11 = pmov %p1986_p8 }
  0x79   : > { %p1988_p13 = pmov %p1986_p8 }
  0x7a   : > { %1294 = vsyncadd (%p1987_p11), [#allocation7], 4294967280 }
  0x7b   : > { %1296 = dma.done.wait (%p1988_p13), [#allocation12], 16   ;;  %p1989_p3 = pmov %p1986_p8 }
  0x7d   : > { %1298 = vsyncadd (%p1989_p3), [#allocation12], 4294967280 }
  0x7e   : > { %253 = sfence }
  0x7f   : > { %v1539_v0 = vld [vmem:[%s231_s28] sm:$0xff]  ;;  %s1014_s26 = sld [smem:[#allocation10 + $0x1]]  ;;  %v1541_v1 = vld [vmem:[%s240_s8] sm:$0xff]  ;;  %v1323_v2 = vmov 0.0   ;;  %s1015_s21 = sld [smem:[#allocation10 + $0x13]]  ;;  %v287_v53 = vlaneseq  ;;  %vm313_vm0 = vcmask 138240  }
  0x80   : > { %279 = vst [vmem:[#allocation2] sm:$0xff] %v1323_v2  ;;  %280 = vst [vmem:[#allocation2 + $0x8] sm:$0xff] %v1323_v2  ;;  %s1324_s24 = smov 17   ;;  %s1325_s25 = smov 16   ;;  %v454_v19 = vcombine.high %v1539_v0, %v1539_v0  ;;  %v729_v46 = vcombine.high %v1541_v1, %v1541_v1  ;;  %vm347_vm3 = vcmask 130048   ;;  %vm384_vm4 = vcmask 121856  }
  0x81   : > { %281 = vst [vmem:[#allocation3] sm:$0xff] %v1323_v2  ;;  %282 = vst [vmem:[#allocation3 + $0x8] sm:$0xff] %v1323_v2  ;;  %s1326_s23 = smov 15   ;;  %s1327_s6 = smov 1   ;;  %v288_v57 = vand.u32 127, %v287_v53  ;;  %vm414_vm7 = vcmask 7168  }
  0x82   : > { %284 = vst [vmem:[#allocation2 + $0x4] sm:$0xff] %v1539_v0  ;;  %286 = vst [vmem:[#allocation3 + $0x4] sm:$0xff] %v1541_v1  ;;  %s1328_s7 = smov 127   ;;  %s1026_s20 = sld [smem:[#allocation10 + $0x7]]  ;;  %vm461_vm8 = vcmask 1039360   ;;  %vm491_vm9 = vcmask 924672  }
  0x83   : > { %s1329_s14 = smov 113   ;;  %s1027_s27 = sld [smem:[#allocation10 + $0x19]]  ;;  %v289_v59 = vadd.s32 128, %v288_v57  ;;  %v290_v61 = vand.u32 15, %v288_v57  ;;  %vm562_vm10 = vcmask 908288   ;;  %vm525_vm11 = vcmask 916480  }
  0x84   : > { %s1330_s29 = smov 111   ;;  %s1331_s9 = smov 112  }
  0x85   : > { %v335_v3 = vstv %s1014_s26  ;;  %v355_v9 = vstv %s1015_s21  ;;  %s1032_s10 = sld [smem:[#allocation10 + $0xa]]  ;;  %s1033_s11 = sld [smem:[#allocation10 + $0x1c]]  ;;  %v291_v62 = vand.u32 15, %v289_v59  ;;  %vm1620_vm1 = vcmp.ge.s32.totalorder %v290_v61, 1 }
  0x86   : > { %s1044_s28 = sld [smem:[#allocation10 + $0x10]]  ;;  %s1045_s30 = sld [smem:[#allocation10 + $0x22]]  ;;  %vm1647_vm5 = vcmp.le.s32.totalorder %v290_v61, 14 }
  0x87   : > { %v451_v17 = vld [vmem:[#allocation2 + $0xc] sm:$0xf]  ;;  %s320_s8 = sld [smem:[#allocation10]]  ;;  %s1013_s26 = sld [smem:[#allocation10 + $0x12]]  ;;  %vm1624_vm2 = vcmp.ge.s32.totalorder %v291_v62, 1  ;;  %vm1651_vm6 = vcmp.le.s32.totalorder %v291_v62, 14 }
  0x88   : > { %v726_v18 = vld [vmem:[#allocation3 + $0xc] sm:$0xf]  ;;  %v481_v21 = vld [vmem:[#allocation2 + $0xc] sm:$0xf]  ;;  %v513_v22 = vstv %s1026_s20  ;;  %s1617_s21 = sld [smem:[#allocation11 + $0x1]]  ;;  %s1643_s20 = sld [smem:[#allocation10 + $0x3]] }
  0x89   : > { %v303_v4 = vld [vmem:[#allocation2 + $0x8] sm:$0xf]  ;;  %v302_v5 = vld [vmem:[#allocation2] sm:$0xff]  ;;  %v1140_v20 = vpack.i.bf16 %v726_v18, %v451_v17  ;;  %v514_v23 = vmul.f32 %v513_v22, %v1539_v0  ;;  %v552_v24 = vld [vmem:[#allocation2 + $0xc] sm:$0xf]  ;;  %v533_v26 = vstv %s1027_s27  ;;  %s1696_s27 = sld [smem:[#allocation10 + $0x5]] }
  0x8a   : > { %311 = vrot.lane.b32.xlu1 %v303_v4, %s1324_s24  ;;  %307 = vrot.lane.b32.xlu0 %v302_v5, %s1324_s24  ;;  %v306_v6 = vcombine.high %v302_v5, %v302_v5  ;;  %v336_v7 = vmul.f32 %v335_v3, %v302_v5  ;;  %v333_v8 = vld [vmem:[#allocation2 + $0x8] sm:$0xf]  ;;  %v356_v11 = vmul.f32 %v355_v9, %v302_v5  ;;  %v511_v27 = vld [vmem:[#allocation2 + $0xc] sm:$0xf]  ;;  %v581_v32 = vld [vmem:[#allocation3] sm:$0xff]  ;;  %p1998_p12 = scmp.ne.s32.totalorder %s1980_s13, 0 }
  0x8b   : > { %v337_v10 = vmul.f32 %v335_v3, %v333_v8  ;;  %v357_v14 = vmul.f32 %v355_v9, %v333_v8  ;;  %v374_v15 = vld [vmem:[#allocation2 + $0x8] sm:$0xf]  ;;  %v518_v25 = vcombine.high %v514_v23, %v514_v23  ;;  %v534_v28 = vmul.f32 %v533_v26, %v1539_v0  ;;  %v582_v34 = vld [vmem:[#allocation3 + $0x8] sm:$0xf]  ;;  %v755_v47 = vld [vmem:[#allocation3 + $0xc] sm:$0xf] }
  0x8c   : > { %v360_v12 = vcombine.high %v356_v11, %v356_v11  ;;  %v340_v13 = vcombine.high %v336_v7, %v336_v7  ;;  %v404_v16 = vld [vmem:[#allocation2 + $0x8] sm:$0xf]  ;;  %v515_v29 = vmul.f32 %v513_v22, %v511_v27  ;;  %v535_v30 = vmul.f32 %v533_v26, %v511_v27  ;;  %v651_v37 = vld [vmem:[#allocation3 + $0x8] sm:$0xf]  ;;  %v824_v50 = vld [vmem:[#allocation3 + $0xc] sm:$0xf] }
  0x8d   : > { %v538_v31 = vcombine.high %v534_v28, %v534_v28  ;;  %v585_v33 = vcombine.high %v581_v32, %v581_v32  ;;  %v613_v35 = vstv %s1032_s10  ;;  %v632_v39 = vstv %s1033_s11  ;;  %v611_v40 = vld [vmem:[#allocation3 + $0x8] sm:$0xf]  ;;  %v784_v51 = vld [vmem:[#allocation3 + $0xc] sm:$0xf]  ;;  %s1702_s10 = sld [smem:[#allocation10 + $0x18]] }
  0x8e   : > { %341 = vrot.lane.b32.xlu1 %v336_v7, %s1325_s25  ;;  %309 = vrot.lane.b32.xlu0 %v306_v6, %s1324_s24  ;;  %v614_v36 = vmul.f32 %v613_v35, %v581_v32  ;;  %v633_v41 = vmul.f32 %v632_v39, %v581_v32  ;;  %v615_v42 = vmul.f32 %v613_v35, %v611_v40  ;;  %v680_v45 = vld [vmem:[#allocation3 + $0x8] sm:$0xf]  ;;  %v786_v48 = vstv %s1044_s28  ;;  %s1704_s11 = sld [smem:[#allocation10 + $0x8]]  ;;  %s1706_s28 = sld [smem:[#allocation10 + $0x1a]] }
  0x8f   : > { %v634_v43 = vmul.f32 %v632_v39, %v611_v40  ;;  %v787_v49 = vmul.f32 %v786_v48, %v1541_v1  ;;  %v805_v52 = vstv %s1045_s30  ;;  %v788_v54 = vmul.f32 %v786_v48, %v784_v51  ;;  %s1711_s30 = sld [smem:[#allocation10 + $0x9]] }
  0x90   : > { %v618_v38 = vcombine.high %v614_v36, %v614_v36  ;;  %v637_v44 = vcombine.high %v633_v41, %v633_v41  ;;  %v806_v56 = vmul.f32 %v805_v52, %v1541_v1  ;;  %v807_v60 = vmul.f32 %v805_v52, %v784_v51 }
  0x91   : > { %v791_v55 = vcombine.high %v787_v49, %v787_v49  ;;  %v321_v7 = vstv %s320_s8  ;;  %v327_v8 = vstv %s1013_s26  ;;  %v300_v18 = vstv %s1617_s21  ;;  %s1713_s8 = sld [smem:[#allocation10 + $0x1b]]  ;;  %s1724_s21 = sld [smem:[#allocation10 + $0xd]] }
  0x92   : > { %345 = vrot.lane.b32.xlu1 %v337_v10, %s1325_s25  ;;  %361 = vrot.lane.b32.xlu0 %v356_v11, %s1325_s25  ;;  %v810_v58 = vcombine.high %v806_v56, %v806_v56  ;;  %v422_v53 = vstv %s1643_s20  ;;  %s1715_s26 = sld [smem:[#allocation10 + $0xb]]  ;;  %s1779_s20 = sld [smem:[#allocation10 + $0x20]] }
  0x96   : > { %363 = vrot.lane.b32.xlu1 %v360_v12, %s1325_s25  ;;  %343 = vrot.lane.b32.xlu0 %v340_v13, %s1325_s25 }
  0x9a   : > { %378 = vrot.lane.b32.xlu1 %v302_v5, %s1326_s23  ;;  %365 = vrot.lane.b32.xlu0 %v357_v14, %s1325_s25 }
  0x9e   : > { %382 = vrot.lane.b32.xlu1 %v374_v15, %s1326_s23  ;;  %380 = vrot.lane.b32.xlu0 %v306_v6, %s1326_s23 }
  0xa2   : > { %410 = vrot.lane.b32.xlu1 %v306_v6, %s1327_s6  ;;  %408 = vrot.lane.b32.xlu0 %v302_v5, %s1327_s6 }
  0xa6   : > { %455 = vrot.lane.b32.xlu1 %v1539_v0, %s1328_s7  ;;  %412 = vrot.lane.b32.xlu0 %v404_v16, %s1327_s6 }
  0xaa   : > { %1141 = vrot.lane.b32.xlu1 %v1140_v20, %s1328_s7  ;;  %457 = vrot.lane.b32.xlu0 %v454_v19, %s1328_s7 }
  0xae   : > { %487 = vrot.lane.b32.xlu1 %v454_v19, %s1329_s14  ;;  %485 = vrot.lane.b32.xlu0 %v1539_v0, %s1329_s14 }
  0xb2   : > { %556 = vrot.lane.b32.xlu1 %v1539_v0, %s1330_s29  ;;  %489 = vrot.lane.b32.xlu0 %v481_v21, %s1329_s14 }
  0xb6   : > { %560 = vrot.lane.b32.xlu1 %v552_v24, %s1330_s29  ;;  %558 = vrot.lane.b32.xlu0 %v454_v19, %s1330_s29 }
  0xba   : > { %521 = vrot.lane.b32.xlu1 %v518_v25, %s1331_s9  ;;  %519 = vrot.lane.b32.xlu0 %v514_v23, %s1331_s9 }
  0xbe   : > { %539 = vrot.lane.b32.xlu1 %v534_v28, %s1331_s9  ;;  %523 = vrot.lane.b32.xlu0 %v515_v29, %s1331_s9 }
  0xc2   : > { %543 = vrot.lane.b32.xlu1 %v535_v30, %s1331_s9  ;;  %541 = vrot.lane.b32.xlu0 %v538_v31, %s1331_s9 }
  0xc6   : > { %588 = vrot.lane.b32.xlu1 %v585_v33, %s1324_s24  ;;  %586 = vrot.lane.b32.xlu0 %v581_v32, %s1324_s24 }
  0xca   : > { %655 = vrot.lane.b32.xlu1 %v581_v32, %s1326_s23  ;;  %590 = vrot.lane.b32.xlu0 %v582_v34, %s1324_s24  ;;  %s296_s24 = sld [smem:[#allocation11]] }
  0xce   : > { %659 = vrot.lane.b32.xlu1 %v651_v37, %s1326_s23  ;;  %657 = vrot.lane.b32.xlu0 %v585_v33, %s1326_s23  ;;  %s1640_s23 = sld [smem:[#allocation10 + $0x14]] }
  0xd0   : > { %v297_v19 = vstv %s296_s24  ;;  %s1726_s24 = sld [smem:[#allocation10 + $0x1f]] }
  0xd2   : > { %621 = vrot.lane.b32.xlu1 %v618_v38, %s1325_s25  ;;  %619 = vrot.lane.b32.xlu0 %v614_v36, %s1325_s25 }
  0xd6   : > { %638 = vrot.lane.b32.xlu1 %v633_v41, %s1325_s25  ;;  %623 = vrot.lane.b32.xlu0 %v615_v42, %s1325_s25  ;;  %v398_v42 = vstv %s1640_s23  ;;  %s1735_s23 = sld [smem:[#allocation10 + $0xc]] }
  0xda   : > { %642 = vrot.lane.b32.xlu1 %v634_v43, %s1325_s25  ;;  %640 = vrot.lane.b32.xlu0 %v637_v44, %s1325_s25  ;;  %s1638_s25 = sld [smem:[#allocation10 + $0x2]] }
  0xde   : > { %686 = vrot.lane.b32.xlu1 %v585_v33, %s1327_s6  ;;  %684 = vrot.lane.b32.xlu0 %v581_v32, %s1327_s6 }
  0xe0   : > { %v392_v41 = vstv %s1638_s25  ;;  %s1733_s25 = sld [smem:[#allocation10 + $0x1d]] }
  0xe2   : > { %730 = vrot.lane.b32.xlu1 %v1541_v1, %s1328_s7  ;;  %688 = vrot.lane.b32.xlu0 %v680_v45, %s1327_s6  ;;  %s1020_s6 = sld [smem:[#allocation10 + $0x4]] }
  0xe6   : > { %759 = vrot.lane.b32.xlu1 %v1541_v1, %s1329_s14  ;;  %732 = vrot.lane.b32.xlu0 %v729_v46, %s1328_s7  ;;  %s1021_s7 = sld [smem:[#allocation10 + $0x16]] }
  0xea   : > { %763 = vrot.lane.b32.xlu1 %v755_v47, %s1329_s14  ;;  %761 = vrot.lane.b32.xlu0 %v729_v46, %s1329_s14  ;;  %s1645_s14 = sld [smem:[#allocation10 + $0x15]] }
  0xec   : > { %v443_v52 = vstv %s1021_s7  ;;  %s1773_s7 = sld [smem:[#allocation10 + $0xe]] }
  0xee   : > { %830 = vrot.lane.b32.xlu1 %v729_v46, %s1330_s29  ;;  %828 = vrot.lane.b32.xlu0 %v1541_v1, %s1330_s29  ;;  %v435_v46 = vstv %s1020_s6  ;;  %s1738_s6 = sld [smem:[#allocation10 + $0x1e]] }
  0xf2   : > { %792 = vrot.lane.b32.xlu1 %v787_v49, %s1331_s9  ;;  %832 = vrot.lane.b32.xlu0 %v824_v50, %s1330_s29  ;;  %s1698_s29 = sld [smem:[#allocation10 + $0x17]] }
  0xf6   : > { %796 = vrot.lane.b32.xlu1 %v788_v54, %s1331_s9  ;;  %794 = vrot.lane.b32.xlu0 %v791_v55, %s1331_s9  ;;  %v428_v54 = vstv %s1645_s14  ;;  %s1856_s14 = sld [smem:[#allocation10 + $0xf]] }
  0xfa   : > { %813 = vrot.lane.b32.xlu1 %v810_v58, %s1331_s9  ;;  %811 = vrot.lane.b32.xlu0 %v806_v56, %s1331_s9  ;;  %v436_v56 = vmul.f32 %v435_v46, %v1539_v0 }
  0xfc   : > { %v312_v63 = vpop.permute.xlu1 %311  ;;  %v308_v2 = vpop.permute.xlu0 %307 }
  0xfe   : > { %815 = vrot.lane.b32.xlu0 %v807_v60, %s1331_s9  ;;  %v444_v60 = vmul.f32 %v443_v52, %v1539_v0  ;;  %s1700_s9 = sld [smem:[#allocation10 + $0x6]] }
 0x100   : > { %v342_v5 = vpop.permute.xlu1 %341  ;;  %v310_v6 = vpop.permute.xlu0 %309 }
 0x101   : > { %v314_v9 = vsel %vm313_vm0, %v308_v2, %v310_v6  ;;  %v315_v10 = vsel %vm313_vm0, %v310_v6, %v312_v63 }
 0x102   : > { %v318_v11 = vsel %vm1620_vm1, %v314_v9, 0.0  ;;  %v319_v12 = vsel %vm1624_vm2, %v315_v10, 0.0 }
 0x103   : > { %v322_v13 = vmul.f32 %v321_v7, %v318_v11  ;;  %v323_v14 = vmul.f32 %v321_v7, %v319_v12  ;;  %v328_v15 = vmul.f32 %v327_v8, %v318_v11  ;;  %v329_v20 = vmul.f32 %v327_v8, %v319_v12 }
 0x104   : > { %v346_v16 = vpop.permute.xlu1 %345  ;;  %v362_v17 = vpop.permute.xlu0 %361  ;;  %v438_v8 = vcombine.high %v436_v56, %v436_v56  ;;  %v446_v12 = vcombine.high %v444_v60, %v444_v60 }
 0x105   : > { %v330_v22 = vadd.f32 %v328_v15, %v300_v18  ;;  %v324_v23 = vadd.f32 %v322_v13, %v297_v19  ;;  %v325_v24 = vadd.f32 %v323_v14, %v297_v19  ;;  %v331_v33 = vadd.f32 %v329_v20, %v300_v18 }
 0x108   : > { %v364_v21 = vpop.permute.xlu1 %363  ;;  %v344_v25 = vpop.permute.xlu0 %343 }
 0x109   : > { %v367_v26 = vsel %vm347_vm3, %v362_v17, %v364_v21  ;;  %v348_v27 = vsel %vm347_vm3, %v342_v5, %v344_v25  ;;  %v349_v28 = vsel %vm347_vm3, %v344_v25, %v346_v16 }
 0x10a   : > { %v371_v29 = vadd.f32 %v367_v26, %v330_v22  ;;  %v352_v30 = vadd.f32 %v348_v27, %v324_v23  ;;  %v353_v31 = vadd.f32 %v349_v28, %v325_v24 }
 0x10c   : > { %v379_v32 = vpop.permute.xlu1 %378  ;;  %v366_v34 = vpop.permute.xlu0 %365 }
 0x10d   : > { %v368_v35 = vsel %vm347_vm3, %v364_v21, %v366_v34 }
 0x10e   : > { %v372_v36 = vadd.f32 %v368_v35, %v331_v33 }
 0x110   : > { %v383_v38 = vpop.permute.xlu1 %382  ;;  %v381_v40 = vpop.permute.xlu0 %380 }
 0x111   : > { %v385_v43 = vsel %vm384_vm4, %v379_v32, %v381_v40  ;;  %v386_v44 = vsel %vm384_vm4, %v381_v40, %v383_v38 }
 0x112   : > { %v389_v45 = vsel %vm1647_vm5, %v385_v43, 0.0  ;;  %v390_v47 = vsel %vm1651_vm6, %v386_v44, 0.0 }
 0x113   : > { %v393_v48 = vmul.f32 %v392_v41, %v389_v45  ;;  %v399_v49 = vmul.f32 %v398_v42, %v389_v45  ;;  %v394_v57 = vmul.f32 %v392_v41, %v390_v47  ;;  %v400_v58 = vmul.f32 %v398_v42, %v390_v47 }
 0x114   : > { %v411_v50 = vpop.permute.xlu1 %410  ;;  %v409_v51 = vpop.permute.xlu0 %408 }
 0x115   : > { %v415_v55 = vsel %vm414_vm7, %v409_v51, %v411_v50  ;;  %v395_v61 = vadd.f32 %v393_v48, %v352_v30  ;;  %v401_v62 = vadd.f32 %v399_v49, %v371_v29  ;;  %v396_v13 = vadd.f32 %v394_v57, %v353_v31 }
 0x116   : > { %v419_v59 = vsel %vm1620_vm1, %v415_v55, 0.0  ;;  %v402_v14 = vadd.f32 %v400_v58, %v372_v36  ;;  %v469_v48 = vstv %s1696_s27  ;;  %v475_v49 = vstv %s1698_s29  ;;  %s1875_s27 = sld [smem:[#allocation10 + $0x21]] }
 0x117   : > { %v423_v63 = vmul.f32 %v422_v53, %v419_v59  ;;  %v429_v2 = vmul.f32 %v428_v54, %v419_v59  ;;  %v505_v55 = vstv %s1702_s10  ;;  %v570_v57 = vstv %s1704_s11  ;;  %s1881_s29 = sld [smem:[#allocation10 + $0x11]]  ;;  %s1011_s10 = sshll.u32 %s1518_s0, 4 }
 0x118   : > { %v456_v5 = vpop.permute.xlu1 %455  ;;  %v413_v6 = vpop.permute.xlu0 %412  ;;  %v576_v58 = vstv %s1706_s28  ;;  %s278_s11 = scalar_lea.vmem [#allocation13], %s1011_s10  ;;  %s1056_s28 = sshll.u32 %s1381_s19, 8 }
 0x119   : > { %v416_v7 = vsel %vm414_vm7, %v411_v50, %v413_v6  ;;  %v425_v9 = vadd.f32 %v423_v63, %v395_v61  ;;  %v431_v10 = vadd.f32 %v429_v2, %v401_v62  ;;  %v605_v6 = vstv %s1713_s8  ;;  %s1332_s19 = smov [#allocation13]  }
 0x11a   : > { %v420_v11 = vsel %vm1624_vm2, %v416_v7, 0.0  ;;  %v668_v7 = vstv %s1715_s26 }
 0x11b   : > { %v424_v15 = vmul.f32 %v422_v53, %v420_v11  ;;  %v430_v16 = vmul.f32 %v428_v54, %v420_v11  ;;  %v1675_v17 = vadd.f32 %v436_v56, %v425_v9  ;;  %v1677_v18 = vadd.f32 %v444_v60, %v431_v10 }
 0x11c   : > { %v1673_v0 = vpop.permute.xlu1 %1141  ;;  %v458_v19 = vpop.permute.xlu0 %457  ;;  %v499_v54 = vstv %s1700_s9  ;;  %s1899_s9 = sld [smem:[#allocation10 + $0x23]] }
 0x11d   : > { %v426_v20 = vadd.f32 %v424_v15, %v396_v13  ;;  %v432_v21 = vadd.f32 %v430_v16, %v402_v14  ;;  %v1143_v40 = vunpack.i.l.bf16 %v1673_v0  ;;  %v462_v50 = vsel %vm461_vm8, %v456_v5, %v458_v19 }
 0x11e   : > { %v466_v61 = vsel %vm1647_vm5, %v462_v50, 0.0  ;;  %v599_v5 = vstv %s1711_s30  ;;  %v841_v4 = vstv %s1881_s29  ;;  %s877_s30 = sshll.u32 %s278_s11, 4  ;;  %s1920_s30 = int_to_ptr.vmem [resolvable:$true] %s877_s30 }
 0x11f   : > { %v441_v22 = vadd.f32 %v438_v8, %v426_v20  ;;  %v449_v23 = vadd.f32 %v446_v12, %v432_v21  ;;  %v463_v43 = vsel %vm461_vm8, %v458_v19, %v1143_v40  ;;  %v470_v12 = vmul.f32 %v469_v48, %v466_v61 }
 0x120   : > { %v488_v24 = vpop.permute.xlu1 %487  ;;  %v486_v25 = vpop.permute.xlu0 %485  ;;  %v467_v45 = vsel %vm1651_vm6, %v463_v43, 0.0  ;;  %v710_v19 = vstv %s1724_s21  ;;  %v703_v40 = vstv %s1738_s6  ;;  %s1918_s21 = scalar_lea.hbm %s1968_s4, %s1056_s28 }
 0x121   : > { %v471_v52 = vmul.f32 %v469_v48, %v467_v45  ;;  %v477_v53 = vmul.f32 %v475_v49, %v467_v45  ;;  %v492_v56 = vsel %vm491_vm9, %v486_v25, %v488_v24  ;;  %v472_v43 = vadd.f32 %v470_v12, %v1675_v17 }
 0x122   : > { %v496_v10 = vsel %vm1620_vm1, %v492_v56, 0.0  ;;  %v476_v56 = vmul.f32 %v475_v49, %v466_v61 }
 0x123   : > { %v473_v8 = vadd.f32 %v471_v52, %v441_v22  ;;  %v479_v9 = vadd.f32 %v477_v53, %v449_v23  ;;  %v718_v23 = vstv %s1726_s24  ;;  %v506_v49 = vmul.f32 %v505_v55, %v496_v10  ;;  %s864_s24 = scalar_lea.sflag [#allocation6], %s1518_s0 }
 0x124   : > { %v1679_v26 = vpop.permute.xlu1 %556  ;;  %v490_v27 = vpop.permute.xlu0 %489 }
 0x125   : > { %v493_v44 = vsel %vm491_vm9, %v488_v24, %v490_v27  ;;  %v500_v24 = vmul.f32 %v499_v54, %v496_v10  ;;  %v674_v27 = vstv %s1733_s25  ;;  %s1239_s25 = scalar_lea.vmem %s1920_s30, 256 }
 0x126   : > { %v497_v51 = vsel %vm1624_vm2, %v493_v44, 0.0  ;;  %p1240_p7 = scmp.ne.s32.totalorder %s1920_s30, %s1239_s25 }
 0x127   : > { %v501_v62 = vmul.f32 %v499_v54, %v497_v51  ;;  %v507_v63 = vmul.f32 %v505_v55, %v497_v51  ;;  %v1790_v51 = vmul.f32 %v718_v23, %v1541_v1  ;;  %v478_v55 = vadd.f32 %v476_v56, %v1677_v18 }
 0x128   : > { %v561_v28 = vpop.permute.xlu1 %560  ;;  %v1681_v29 = vpop.permute.xlu0 %558  ;;  %p1241_p0 = pnand %p1240_p7, %p1998_p12 }
 0x129   : > { %v564_v2 = vsel %vm562_vm10, %v1681_v29, %v561_v28  ;;  %v503_v21 = vadd.f32 %v501_v62, %v473_v8  ;;  %v509_v22 = vadd.f32 %v507_v63, %v479_v9  ;;  %v697_v28 = vstv %s1735_s23  ;;  %s1243_s23 = sshll.u32 %s1332_s19, 4  ;;  %s1244_s23 = int_to_ptr.vmem [resolvable:$false] %s1243_s23 }
 0x12a   : > { %v568_v20 = vsel %vm1651_vm6, %v564_v2, 0.0  ;;  %v563_v44 = vsel %vm562_vm10, %v1679_v26, %v1681_v29  ;;  %v502_v26 = vadd.f32 %v500_v24, %v472_v43  ;;  %v508_v18 = vadd.f32 %v506_v49, %v478_v55  ;;  %p1242_p2 = pneg %p1241_p0  ;;  %s1245_s6 = scalar_lea.vmem %s1244_s23, 512 }
 0x12b   : > { %v572_v45 = vmul.f32 %v570_v57, %v568_v20  ;;  %v578_v52 = vmul.f32 %v576_v58, %v568_v20  ;;  %v567_v62 = vsel %vm1647_vm5, %v563_v44, 0.0  ;;  %p1246_p10 = scmp.lt.s32.totalorder %s1920_s30, %s1244_s23  ;;  %p1247_p1 = scmp.lt.s32.totalorder %s1245_s6, %s1239_s25 }
 0x12c   : > { %v1683_v30 = vpop.permute.xlu1 %521  ;;  %v1685_v31 = vpop.permute.xlu0 %519  ;;  %v571_v10 = vmul.f32 %v570_v57, %v567_v62 }
 0x12d   : > { %v526_v53 = vsel %vm525_vm11, %v1685_v31, %v1683_v30  ;;  %p1248_p4 = por %p1247_p1, %p1246_p10 }
 0x12e   : > { %v530_v61 = vadd.f32 %v526_v53, %v502_v26 }
 0x12f   : > { %p1249_p6 = pnand %p1248_p4, %p1242_p2 }
 0x130   : > { %v1687_v32 = vpop.permute.xlu1 %539  ;;  %v524_v33 = vpop.permute.xlu0 %523  ;;  %v573_v23 = vadd.f32 %v571_v10, %v530_v61 }
 0x131   : > { %v527_v13 = vsel %vm525_vm11, %v1683_v30, %v524_v33 }
 0x132   : > { %v531_v33 = vadd.f32 %v527_v13, %v503_v21  ;;  %v749_v21 = vstv %s1779_s20 }
 0x134   : > { %v544_v34 = vpop.permute.xlu1 %543  ;;  %v1689_v35 = vpop.permute.xlu0 %541  ;;  %v574_v63 = vadd.f32 %v572_v45, %v531_v33 }
 0x135   : > { %v546_v14 = vsel %vm525_vm11, %v1689_v35, %v544_v34 }
 0x136   : > { %v550_v34 = vadd.f32 %v546_v14, %v509_v22  ;;  %v743_v14 = vstv %s1773_s7  ;;  %v1144_v22 = vunpack.i.h.bf16 %v1673_v0 }
 0x138   : > { %v1691_v36 = vpop.permute.xlu1 %588  ;;  %v1693_v38 = vpop.permute.xlu0 %586  ;;  %v580_v30 = vadd.f32 %v578_v52, %v550_v34  ;;  %v577_v52 = vmul.f32 %v576_v58, %v567_v62 }
 0x139   : > { %v592_v29 = vsel %vm313_vm0, %v1693_v38, %v1691_v36 }
 0x13a   : > { %v596_v9 = vsel %vm1620_vm1, %v592_v29, 0.0 }
 0x13b   : > { %v600_v57 = vmul.f32 %v599_v5, %v596_v9  ;;  %v606_v53 = vmul.f32 %v605_v6, %v596_v9 }
 0x13c   : > { %v1708_v41 = vpop.permute.xlu1 %655  ;;  %v591_v42 = vpop.permute.xlu0 %590 }
 0x13d   : > { %v593_v11 = vsel %vm313_vm0, %v1691_v36, %v591_v42  ;;  %v1777_v42 = vmul.f32 %v710_v19, %v1541_v1 }
 0x13e   : > { %v597_v25 = vsel %vm1624_vm2, %v593_v11, 0.0 }
 0x13f   : > { %v601_v17 = vmul.f32 %v599_v5, %v597_v25  ;;  %v607_v54 = vmul.f32 %v605_v6, %v597_v25  ;;  %v713_v1 = vcombine.high %v1777_v42, %v1777_v42 }
 0x140   : > { %v1720_v46 = vpop.permute.xlu1 %659  ;;  %v1722_v47 = vpop.permute.xlu0 %657 }
 0x141   : > { %v662_v31 = vsel %vm384_vm4, %v1722_v47, %v1720_v46  ;;  %v603_v11 = vadd.f32 %v601_v17, %v574_v63  ;;  %v609_v12 = vadd.f32 %v607_v54, %v580_v30  ;;  %v721_v46 = vcombine.high %v1790_v51, %v1790_v51 }
 0x142   : > { %v666_v13 = vsel %vm1651_vm6, %v662_v31, 0.0  ;;  %v661_v33 = vsel %vm384_vm4, %v1708_v41, %v1722_v47 }
 0x144   : > { %v1744_v59 = vpop.permute.xlu1 %621  ;;  %v1746_v60 = vpop.permute.xlu0 %619 }
 0x145   : > { %v625_v43 = vsel %vm347_vm3, %v1746_v60, %v1744_v59  ;;  %v602_v60 = vadd.f32 %v600_v57, %v573_v23 }
 0x147   : > { %v629_v6 = vadd.f32 %v625_v43, %v602_v60  ;;  %v778_v43 = vstv %s1875_s27 }
 0x148   : > { %v1763_v15 = vpop.permute.xlu1 %638  ;;  %v624_v16 = vpop.permute.xlu0 %623 }
 0x149   : > { %v626_v36 = vsel %vm347_vm3, %v1744_v59, %v624_v16  ;;  %v545_v16 = vsel %vm525_vm11, %v1687_v32, %v1689_v35  ;;  %v670_v32 = vmul.f32 %v668_v7, %v666_v13  ;;  %v676_v35 = vmul.f32 %v674_v27, %v666_v13 }
 0x14a   : > { %v630_v19 = vadd.f32 %v626_v36, %v603_v11  ;;  %v549_v34 = vadd.f32 %v545_v16, %v508_v18  ;;  %v665_v59 = vsel %vm1647_vm5, %v661_v33, 0.0  ;;  %v772_v13 = vstv %s1856_s14 }
 0x14b   : > { %v669_v30 = vmul.f32 %v668_v7, %v665_v59 }
 0x14c   : > { %v643_v48 = vpop.permute.xlu1 %642  ;;  %v1787_v50 = vpop.permute.xlu0 %640  ;;  %v672_v45 = vadd.f32 %v670_v32, %v630_v19  ;;  %v579_v62 = vadd.f32 %v577_v52, %v549_v34 }
 0x14d   : > { %v645_v38 = vsel %vm347_vm3, %v1787_v50, %v643_v48  ;;  %v644_v36 = vsel %vm347_vm3, %v1763_v15, %v1787_v50 }
 0x14e   : > { %v649_v20 = vadd.f32 %v645_v38, %v609_v12  ;;  %v608_v7 = vadd.f32 %v606_v53, %v579_v62  ;;  %v671_v12 = vadd.f32 %v669_v30, %v629_v6 }
 0x150   : > { %v687_v2 = vpop.permute.xlu1 %686  ;;  %v685_v8 = vpop.permute.xlu0 %684  ;;  %v678_v48 = vadd.f32 %v676_v35, %v649_v20  ;;  %v648_v50 = vadd.f32 %v644_v36, %v608_v7  ;;  %v675_v20 = vmul.f32 %v674_v27, %v665_v59 }
 0x151   : > { %v690_v5 = vsel %vm414_vm7, %v685_v8, %v687_v2 }
 0x152   : > { %v694_v56 = vsel %vm1620_vm1, %v690_v5, 0.0 }
 0x153   : > { %v698_v38 = vmul.f32 %v697_v28, %v694_v56 }
 0x154   : > { %v731_v24 = vpop.permute.xlu1 %730  ;;  %v689_v25 = vpop.permute.xlu0 %688 }
 0x155   : > { %v691_v0 = vsel %vm414_vm7, %v687_v2, %v689_v25  ;;  %v700_v10 = vadd.f32 %v698_v38, %v671_v12 }
 0x156   : > { %v695_v44 = vsel %vm1624_vm2, %v691_v0, 0.0 }
 0x157   : > { %v699_v41 = vmul.f32 %v697_v28, %v695_v44  ;;  %v705_v47 = vmul.f32 %v703_v40, %v695_v44  ;;  %v715_v25 = vadd.f32 %v1777_v42, %v700_v10 }
 0x158   : > { %v760_v17 = vpop.permute.xlu1 %759  ;;  %v733_v54 = vpop.permute.xlu0 %732 }
 0x159   : > { %v701_v26 = vadd.f32 %v699_v41, %v672_v45  ;;  %v707_v29 = vadd.f32 %v705_v47, %v678_v48  ;;  %v737_v58 = vsel %vm461_vm8, %v733_v54, %v1144_v22  ;;  %v736_v2 = vsel %vm461_vm8, %v731_v24, %v733_v54 }
 0x15a   : > { %v741_v63 = vsel %vm1651_vm6, %v737_v58, 0.0  ;;  %v740_v55 = vsel %vm1647_vm5, %v736_v2, 0.0  ;;  %v704_v22 = vmul.f32 %v703_v40, %v694_v56  ;;  %v677_v24 = vadd.f32 %v675_v20, %v648_v50 }
 0x15b   : > { %v716_v31 = vadd.f32 %v713_v1, %v701_v26  ;;  %v724_v49 = vadd.f32 %v721_v46, %v707_v29  ;;  %v745_v61 = vmul.f32 %v743_v14, %v741_v63  ;;  %v751_v8 = vmul.f32 %v749_v21, %v741_v63 }
 0x15c   : > { %v764_v9 = vpop.permute.xlu1 %763  ;;  %v762_v11 = vpop.permute.xlu0 %761  ;;  %v744_v57 = vmul.f32 %v743_v14, %v740_v55  ;;  %v706_v34 = vadd.f32 %v704_v22, %v677_v24  ;;  %v750_v5 = vmul.f32 %v749_v21, %v740_v55  ;;  %v847_v63 = vstv %s1899_s9 }
 0x15d   : > { %v747_v1 = vadd.f32 %v745_v61, %v716_v31  ;;  %v753_v46 = vadd.f32 %v751_v8, %v724_v49  ;;  %v765_v15 = vsel %vm491_vm9, %v760_v17, %v762_v11  ;;  %v766_v28 = vsel %vm491_vm9, %v762_v11, %v764_v9 }
 0x15e   : > { %v769_v23 = vsel %vm1620_vm1, %v765_v15, 0.0  ;;  %v770_v18 = vsel %vm1624_vm2, %v766_v28, 0.0  ;;  %v746_v3 = vadd.f32 %v744_v57, %v715_v25  ;;  %v723_v47 = vadd.f32 %v1790_v51, %v706_v34 }
 0x15f   : > { %v773_v33 = vmul.f32 %v772_v13, %v769_v23  ;;  %v774_v32 = vmul.f32 %v772_v13, %v770_v18  ;;  %v779_v52 = vmul.f32 %v778_v43, %v769_v23  ;;  %v780_v56 = vmul.f32 %v778_v43, %v770_v18 }
 0x160   : > { %v831_v16 = vpop.permute.xlu1 %830  ;;  %v829_v19 = vpop.permute.xlu0 %828  ;;  %v752_v54 = vadd.f32 %v750_v5, %v723_v47 }
 0x161   : > { %v834_v35 = vsel %vm562_vm10, %v829_v19, %v831_v16  ;;  %v775_v45 = vadd.f32 %v773_v33, %v746_v3  ;;  %v776_v48 = vadd.f32 %v774_v32, %v747_v1  ;;  %v782_v31 = vadd.f32 %v780_v56, %v753_v46 }
 0x162   : > { %v838_v14 = vsel %vm1647_vm5, %v834_v35, 0.0  ;;  %v781_v6 = vadd.f32 %v779_v52, %v752_v54 }
 0x163   : > { %v842_v60 = vmul.f32 %v841_v4, %v838_v14  ;;  %v848_v36 = vmul.f32 %v847_v63, %v838_v14 }
 0x164   : > { %v793_v27 = vpop.permute.xlu1 %792  ;;  %v833_v0 = vpop.permute.xlu0 %832 }
 0x165   : > { %v835_v40 = vsel %vm562_vm10, %v831_v16, %v833_v0 }
 0x166   : > { %v839_v42 = vsel %vm1651_vm6, %v835_v40, 0.0 }
 0x167   : > { %v843_v37 = vmul.f32 %v841_v4, %v839_v42  ;;  %v849_v38 = vmul.f32 %v847_v63, %v839_v42 }
 0x168   : > { %v797_v44 = vpop.permute.xlu1 %796  ;;  %v795_v41 = vpop.permute.xlu0 %794 }
 0x169   : > { %v798_v53 = vsel %vm525_vm11, %v793_v27, %v795_v41  ;;  %v799_v59 = vsel %vm525_vm11, %v795_v41, %v797_v44 }
 0x16a   : > { %v802_v17 = vadd.f32 %v798_v53, %v775_v45  ;;  %v803_v39 = vadd.f32 %v799_v59, %v776_v48 }
 0x16c   : > { %v844_v21 = vadd.f32 %v842_v60, %v802_v17  ;;  %v845_v26 = vadd.f32 %v843_v37, %v803_v39  ;;  %v814_v29 = vpop.permute.xlu1 %813  ;;  %v812_v58 = vpop.permute.xlu0 %811 }
 0x16d   : > { %v817_v51 = vsel %vm525_vm11, %v812_v58, %v814_v29 }
 0x16e   : > { %v854_v62 = vcombine.low %v844_v21, %v845_v26  ;;  %v821_v30 = vadd.f32 %v817_v51, %v781_v6 }
 0x170   : > { %856 = vst [vmem:[%s278_s11] sm:$0xff] %v854_v62  ;;  %v816_v49 = vpop.permute.xlu0 %815  ;;  %v850_v8 = vadd.f32 %v848_v36, %v821_v30 }
 0x171   : > { %v818_v61 = vsel %vm525_vm11, %v814_v29, %v816_v49 }
 0x172   : > { %v822_v2 = vadd.f32 %v818_v61, %v782_v31 }
 0x174   : > { %v851_v9 = vadd.f32 %v849_v38, %v822_v2 }
 0x176   : > { %v859_v11 = vcombine.low %v850_v8, %v851_v9 }
 0x178   : > { %1048 = vst [vmem:[%s278_s11 + $0x8] sm:$0xff] %v859_v11 }
 0x179   : > { %1252 = shalt.err (!%p1249_p6)
}
 0x17a   : > { %s1253_s7 = scalar_lea.hbm %s1918_s21, 256  ;;  %s1257_s27 = scalar_lea.hbm %s1968_s4, 512 }
 0x17b   : > { %p1254_p9 = scmp.ne.s32.totalorder %s1918_s21, %s1253_s7  ;;  %p1258_p11 = scmp.lt.u32.totalorder %s1918_s21, %s1968_s4 }
 0x17c   : > { %p1259_p13 = scmp.lt.u32.totalorder %s1257_s27, %s1253_s7  ;;  %p1261_p7 = scmp.lt.u32.totalorder %s1253_s7, %s1918_s21 }
 0x17d   : > { %p1255_p5 = pnand %p1254_p9, %p1998_p12 }
 0x17e   : > { %p1260_p3 = por %p1259_p13, %p1258_p11 }
 0x17f   : > { %p1256_p8 = pneg %p1255_p5 }
 0x180   : > { %p1262_p0 = por %p1261_p7, %p1260_p3 }
 0x182   : > { %p1263_p2 = pnand %p1262_p0, %p1256_p8 }
 0x184   : > { %1266 = shalt.err (!%p1263_p2)
}
 0x185   : > { %s1333_s10 = smov 128   ;;  %s1334_s11 = smov 8  }
 0x186   : > { %1069 = dma.vmem_to_hbm [thread:$0]  (%p1998_p12), %s1920_s30, 256, %s1918_s21, %s864_s24, %s1333_s10, %s1333_s10, %s1334_s11  }
 0x187 PF: > { %s892_s28 = sand.u32 1, %s1305_s15   ;;  %p1999_p10 = scmp.ne.s32.totalorder %s1976_s22, 0 }
 0x188   : > { %p2000_p1 = scmp.ge.s32.totalorder %s1317_s18, 2  ;;  %s893_s8 = scalar_lea.sflag [#allocation6], %s892_s28 }
 0x18a   : > { %p1086_p4 = pnand %p2000_p1, %p1999_p10 }
 0x18c   : > { %1300 = dma.done.wait (!%p1086_p4), %s893_s8, 256  }
 0x18d   : > { %1302 = vsyncadd (!%p1086_p4), %s893_s8, 4294967040  ;;  %p22_p6 = scmp.ge.s32.totalorder %s1420_s5, 4   ;;  %s2001_s15 = smov %s1309_s16 }
 0x18e   : > { %s2002_s16 = smov %s1313_s17  ;;  %s2003_s17 = smov %s1435_s12 }
 0x18f   : > { %s2004_s18 = smov %s1420_s5  ;;  %24 = sbr.rel (!%p22_p6) target bundleno = 11 (0xb), region = 104 }
 0x196   :  { %898 = vsyncpa [#allocation5], 1 }
 0x197   :  { %900 = vsyncpa [#allocation5 + $0x1], 1 }
 0x198   :  { %901 = vsyncpa [#allocation9], 1 }
 0x199   :  { %903 = vsyncpa [#allocation9 + $0x1], 1 }
 0x19a   :  { %904 = vsyncpa [#allocation6], 1 }
 0x19b   :  { %906 = vsyncpa [#allocation6 + $0x1], 1 }
 0x19c   :  { %907 = vsyncpa [#allocation7], 1 }
 0x19d   :  { %909 = vsyncpa [#allocation7 + $0x1], 1 }
 0x19e   :  { %910 = vsyncpa [#allocation12], 1 }

</bundles_post_ra>
